<compile_context>
chip_gen: v7x
topology: tpu7x:2x2x1
jax: 0.10.0
libtpu: 0.0.40
codegen_flags: <defaults>
</compile_context>

<pallas_src>
import jax
import jax.numpy as jnp
from jax.experimental import pallas as pl
from jax.experimental.pallas import tpu as pltpu


def _add_kernel(update_ref, verts_ref, out_ref):
    # Pure elementwise hot path on the VPU: out = update + verts.
    out_ref[...] = update_ref[...] + verts_ref[...]


_LANE = 1024  # lane-dense last dim (multiple of 128)


def _sublane_multiple(dtype):
    # f32 -> 8, bf16 -> 16, int8/fp8 -> 32 (sub-32-bit dtypes pack along sublanes).
    itemsize = jnp.dtype(dtype).itemsize
    return max(8, 32 // itemsize)


def _max_row_tile():
    # Generation-aware tile cap: 8 MiB blocks on 128-MiB-VMEM parts (v5e/v6e),
    # 4 MiB blocks on v7x's 64 MiB VMEM.  Falls back to the conservative value.
    try:
        vmem_cap = pltpu.get_tpu_info().vmem_capacity_bytes
    except Exception:
        vmem_cap = 64 << 20
    return 2048 if vmem_cap >= (100 << 20) else 1024


def _pick_row_tile(rows, sub, max_rows):
    # Small inputs: one full-extent block (always a legal block shape).
    if rows <= 2 * sub:
        return rows
    # Otherwise aim for >= 2 blocks (so v7x's two TensorCores both get work),
    # each a multiple of the dtype's sublane tile, capped at max_rows.
    half = (rows // 2) // sub * sub
    return max(sub, min(max_rows, half))


@jax.jit
def vertex_offset_forward(update, verts):
    """Pallas implementation of Model.forward(): update + verts."""
    assert update.shape == verts.shape
    assert update.dtype == verts.dtype
    orig_shape = update.shape
    dtype = update.dtype
    total = int(update.size)

    # ---- lane-dense 2D layout (pad only the ragged tail, if any) ----------
    rows = pl.cdiv(total, _LANE)
    padded_total = rows * _LANE
    needs_pad = padded_total != total

    def to_slab(x):
        flat = jnp.ravel(x)  # free: contiguous reshape
        if needs_pad:
            flat = jnp.pad(flat, (0, padded_total - total))  # <= 1023 elements
        return flat.reshape(rows, _LANE)

    upd2d = to_slab(update)
    vrt2d = to_slab(verts)

    # ---- tiling ------------------------------------------------------------
    sub = _sublane_multiple(dtype)
    row_tile = _pick_row_tile(rows, sub, _max_row_tile())
    grid_rows = pl.cdiv(rows, row_tile)  # ragged last block is masked by Pallas

    block_bytes = row_tile * _LANE * jnp.dtype(dtype).itemsize
    # 3 operands x 2 pipeline buffers, plus compiler scratch headroom.
    vmem_limit = int(min(96 << 20, max(16 << 20, 3 * 2 * block_bytes + (4 << 20))))

    spec = pl.BlockSpec((row_tile, _LANE), lambda i: (i, 0))

    out2d = pl.pallas_call(
        _add_kernel,
        out_shape=jax.ShapeDtypeStruct((rows, _LANE), dtype),
        grid=(grid_rows,),
        in_specs=[spec, spec],
        out_specs=spec,
        compiler_params=pltpu.CompilerParams(
            dimension_semantics=("parallel",),
            vmem_limit_bytes=vmem_limit,
            allow_input_fusion=[True, True],
        ),
    )(upd2d, vrt2d)

    if needs_pad:
        return out2d.reshape(-1)[:total].reshape(orig_shape)
    return out2d.reshape(orig_shape)


if __name__ == "__main__":
    # Deterministic small setup consistent with the module: batches of meshes
    # with V vertices x 3 coords.  V deliberately not tile-aligned to exercise
    # both the padded-tail and single-block paths.
    key = jax.random.PRNGKey(0)
    k_verts, k_update = jax.random.split(key)

    cases = [(2, 129, 3), (4, 642, 3)]
    for B, V, C in cases:
        kv = jax.random.fold_in(k_verts, V)
        ku = jax.random.fold_in(k_update, V)

        # "vertices" buffer (the fixed mesh) — deterministic synthetic data.
        verts = jax.random.normal(kv, (B, V, C), dtype=jnp.float32)
        # Parameter init matching torch.rand(shape) * 0.001 (uniform [0,1) * 1e-3).
        update = jax.random.uniform(ku, (B, V, C), dtype=jnp.float32) * 0.001

        out = jax.block_until_ready(vertex_offset_forward(update, verts))

        # Correctness check against the plain-JAX reference of the forward pass.
        ref = update + verts
        assert out.shape == (B, V, C)
        assert out.dtype == jnp.float32
        assert jnp.allclose(out, ref, atol=1e-6), "Pallas output mismatch"

    print("KERNEL_OK")
</pallas_src>

<mosaic_0001>
module attributes {stable_mosaic.version = 11 : i64} {
  func.func @_add_kernel(%arg0: i32, %arg1: memref<1x1024xf32, #tpu.memory_space<vmem>>, %arg2: memref<1x1024xf32, #tpu.memory_space<vmem>>, %arg3: memref<1x1024xf32, #tpu.memory_space<vmem>>) attributes {dimension_semantics = [#tpu.dimension_semantics<parallel>], iteration_bounds = array<i64: 1>, scalar_prefetch = 0 : i64, scratch_operands = 0 : i64, tpu.core_type = #tpu.core_type<tc>, window_params = [{transform_indices = @transform_0, window_bounds = array<i64: 1, 1024>}, {transform_indices = @transform_1, window_bounds = array<i64: 1, 1024>}, {transform_indices = @transform_2, window_bounds = array<i64: 1, 1024>}]} {
    %c0 = arith.constant 0 : index
    %c0_0 = arith.constant 0 : index
    %0 = vector.load %arg1[%c0, %c0_0] : memref<1x1024xf32, #tpu.memory_space<vmem>>, vector<1x1024xf32>
    %c0_1 = arith.constant 0 : index
    %c0_2 = arith.constant 0 : index
    %1 = vector.load %arg2[%c0_1, %c0_2] : memref<1x1024xf32, #tpu.memory_space<vmem>>, vector<1x1024xf32>
    %2 = arith.addf %0, %1 : vector<1x1024xf32>
    %c0_3 = arith.constant 0 : index
    %c0_4 = arith.constant 0 : index
    %3 = vector.load %arg3[%c0_3, %c0_4] : memref<1x1024xf32, #tpu.memory_space<vmem>>, vector<1x1024xf32>
    tpu.vector_store %arg3[%c0_3, %c0_4], %2 {strides = array<i32>} : memref<1x1024xf32, #tpu.memory_space<vmem>>, vector<1x1024xf32>,
    return
  }
  func.func @transform_0(%arg0: i32) -> (i32, i32) {
    %c0_i32 = arith.constant 0 : i32
    %c0_i32_0 = arith.constant 0 : i32
    return %arg0, %c0_i32 : i32, i32
  }
  func.func @transform_1(%arg0: i32) -> (i32, i32) {
    %c0_i32 = arith.constant 0 : i32
    %c0_i32_0 = arith.constant 0 : i32
    return %arg0, %c0_i32 : i32, i32
  }
  func.func @transform_2(%arg0: i32) -> (i32, i32) {
    %c0_i32 = arith.constant 0 : i32
    %c0_i32_0 = arith.constant 0 : i32
    return %arg0, %c0_i32 : i32, i32
  }
}

</mosaic_0001>

<bundles_post_ra>
// kernel: vertex_offset_forward.1
= control target key start
LH: loop header
LB: loop body
LE: loop exit
PB: predicated region body
PF: predicated region fallthrough
CT: control target
= control target key end

     0   :  { %s43_s0 = inlined_call_operand.vmem [shape: f32[1,1024], index: 0, kind: input, shape index: {}]   ;;  %s44_s1 = inlined_call_operand.vmem [shape: f32[1,1024], index: 1, kind: input, shape index: {}]   ;;  %s45_s2 = inlined_call_operand.vmem [shape: f32[1,1024], index: 2, kind: output, shape index: {}]  }
   0x1   :  { %v11_v0 = vld [vmem:[%s43_s0] sm:$0xff] }
   0x2   :  { %v12_v1 = vld [vmem:[%s44_s1] sm:$0xff] }
   0x3   :  { %v13_v2 = vadd.f32 %v12_v1, %v11_v0 }
   0x5   :  { %14 = vst [vmem:[%s45_s2] sm:$0xff] %v13_v2 }

</bundles_post_ra>
